<compile_context>
chip_gen: v5e
topology: v5e:2x2
jax: 0.10.0
libtpu: 0.0.40
codegen_flags: <defaults>
</compile_context>

<pallas_src>
import jax
import jax.numpy as jnp
from jax.experimental import pallas as pl
from jax.experimental.pallas import tpu as pltpu


def _round_up(x: int, m: int) -> int:
    return ((x + m - 1) // m) * m


def _pick_tile(dim: int, align: int, cap: int) -> int:
    """Largest multiple of `align` that divides `dim` and is <= cap.

    `dim` is always a multiple of `align`, so this always succeeds."""
    cap = max(align, min(cap, dim))
    cap = (cap // align) * align
    for t in range(cap, align - 1, -align):
        if dim % t == 0:
            return t
    return align


# ---------------------------------------------------------------------------
# Kernels
# ---------------------------------------------------------------------------
def linear_kernel_f32(x_ref, w_ref, b_ref, o_ref):
    """f32 output: accumulate directly into the (resident) output block."""
    @pl.when(pl.program_id(2) == 0)
    def _():
        # Bias seeds the accumulator; epilogue add is eliminated.
        o_ref[...] = jnp.broadcast_to(b_ref[...], o_ref.shape).astype(o_ref.dtype)

    # x tile (tm, tk) @ w tile (tk, tn): contraction dim on sublanes of the RHS
    # -> clean MXU weight push, no per-tile transpose.
    o_ref[...] += jnp.dot(x_ref[...], w_ref[...], preferred_element_type=jnp.float32)


def linear_kernel_acc(x_ref, w_ref, b_ref, o_ref, acc_ref):
    """Narrow (e.g. bf16) output: f32 VMEM accumulator, cast+store in epilogue."""
    @pl.when(pl.program_id(2) == 0)
    def _():
        acc_ref[...] = jnp.broadcast_to(
            b_ref[...].astype(jnp.float32), acc_ref.shape)

    acc_ref[...] += jnp.dot(x_ref[...], w_ref[...],
                            preferred_element_type=jnp.float32)

    @pl.when(pl.program_id(2) == pl.num_programs(2) - 1)
    def _():
        o_ref[...] = acc_ref[...].astype(o_ref.dtype)


# ---------------------------------------------------------------------------
# Parameter preparation (run once at "load time", outside the hot path)
# ---------------------------------------------------------------------------
def prepare_linear_params(weight, bias):
    """weight: (out_f, in_f) PyTorch layout; bias: (out_f,) or None.

    Returns (w_t, b2, out_f): weight transposed to (in_f, out_f) and zero-padded
    to 128-multiples; bias padded and reshaped to (1, Np)."""
    out_f, in_f = weight.shape
    Kp = _round_up(in_f, 128)
    Np = _round_up(out_f, 128)
    w_t = weight.T  # (in_f, out_f): contraction dim on sublanes for the MXU RHS
    if (Kp, Np) != (in_f, out_f):
        w_t = jnp.pad(w_t, ((0, Kp - in_f), (0, Np - out_f)))
    if bias is None:
        b = jnp.zeros((Np,), dtype=weight.dtype)
    else:
        b = bias if Np == out_f else jnp.pad(bias, (0, Np - out_f))
    return w_t, b.reshape(1, Np), out_f


# ---------------------------------------------------------------------------
# Forward pass
# ---------------------------------------------------------------------------
def linear_forward(x, w_t, b2, out_features):
    """x: (..., in_features); w_t/b2 from prepare_linear_params."""
    orig_shape = x.shape
    in_f = orig_shape[-1]
    Kp, Np = w_t.shape
    assert Kp >= in_f and Np >= out_features

    x2 = x.reshape(-1, in_f)
    M = x2.shape[0]

    out_dtype = x.dtype
    x_itemsize = jnp.dtype(x.dtype).itemsize
    w_itemsize = jnp.dtype(w_t.dtype).itemsize
    out_itemsize = jnp.dtype(out_dtype).itemsize

    # Sublane alignment for the packed dtype of x (8 for f32, 16 bf16, 32 int8).
    sub = max(8, 32 // x_itemsize)
    Mp = _round_up(M, sub)
    if (Mp, Kp) != (M, in_f):
        x2 = jnp.pad(x2, ((0, Mp - M), (0, Kp - in_f)))

    # Tiles: largest divisors of the (minimally padded) dims, capped so the
    # double-buffered footprint stays ~<=22 MiB (safe on all generations).
    tm = _pick_tile(Mp, sub, 512)
    tn = _pick_tile(Np, 128, 1024)
    tk = _pick_tile(Kp, 128, 1024)

    # v7x megacore: if both parallel axes have a single block, split N across
    # the two TensorCores (keep tn a 128-multiple).  Harmless on v5e/v6e.
    if (Mp // tm) == 1 and (Np // tn) == 1 and Np % 256 == 0:
        tn = Np // 2

    grid = (Mp // tm, Np // tn, Kp // tk)

    use_scratch = out_dtype != jnp.float32
    kernel = linear_kernel_acc if use_scratch else linear_kernel_f32
    scratch = [pltpu.VMEM((tm, tn), jnp.float32)] if use_scratch else []

    # Explicit scoped-VMEM limit derived from the actual footprint
    # (double-buffered inputs + double-buffered output + optional accumulator),
    # with headroom for internal scratch; stays < v7x's 64 MiB physical VMEM.
    vmem_bytes = (2 * (tm * tk * x_itemsize + tk * tn * w_itemsize + tn * w_itemsize)
                  + 2 * tm * tn * out_itemsize
                  + (tm * tn * 4 if use_scratch else 0))
    vmem_limit = int(min(max(vmem_bytes + (8 << 20), 32 << 20), 56 << 20))

    cost = pl.CostEstimate(
        flops=2 * Mp * Np * Kp,
        transcendentals=0,
        bytes_accessed=(Mp * Kp * x_itemsize * (Np // tn)      # x re-read per N tile
                        + Kp * Np * w_itemsize * (Mp // tm)    # W re-read per M tile
                        + Np * w_itemsize * (Mp // tm)         # bias
                        + Mp * Np * out_itemsize),             # output write
    )

    out = pl.pallas_call(
        kernel,
        out_shape=jax.ShapeDtypeStruct((Mp, Np), out_dtype),
        grid=grid,
        in_specs=[
            pl.BlockSpec((tm, tk), lambda i, j, k: (i, k)),   # activations
            pl.BlockSpec((tk, tn), lambda i, j, k: (k, j)),   # weight (K on sublanes)
            pl.BlockSpec((1, tn), lambda i, j, k: (0, j)),    # bias
        ],
        out_specs=pl.BlockSpec((tm, tn), lambda i, j, k: (i, j)),
        scratch_shapes=scratch,
        compiler_params=pltpu.CompilerParams(
            dimension_semantics=("parallel", "parallel", "arbitrary"),
            vmem_limit_bytes=vmem_limit),
        cost_estimate=cost,
    )(x2, w_t, b2)

    out = out[:M, :out_features]
    return out.reshape(*orig_shape[:-1], out_features)


def linear(x, weight, bias):
    """One-shot convenience wrapper (prep + forward). Prefer preparing params once."""
    w_t, b2, out_f = prepare_linear_params(weight, bias)
    return linear_forward(x, w_t, b2, out_f)


if __name__ == "__main__":
    key = jax.random.PRNGKey(0)
    ks = jax.random.split(key, 9)

    # --- Test 1: small shapes consistent with the module (batch=8, in=32, out=16)
    B, in_f, out_f = 8, 32, 16
    x = jax.random.normal(ks[0], (B, in_f), dtype=jnp.float32)
    weight = jax.random.normal(ks[1], (out_f, in_f), dtype=jnp.float32) * 0.1
    bias = jax.random.normal(ks[2], (out_f,), dtype=jnp.float32) * 0.1

    w_t, b2, nf = prepare_linear_params(weight, bias)
    out = jax.block_until_ready(linear_forward(x, w_t, b2, nf))
    ref = x @ weight.T + bias
    assert out.shape == (B, out_f)
    assert jnp.allclose(out, ref, atol=1e-5, rtol=1e-5)

    # --- Test 2: the previously pad-wasteful shape (640/384): now zero waste.
    B2, in2, out2 = 256, 640, 384
    x_b = jax.random.normal(ks[3], (B2, in2), dtype=jnp.float32)
    w_b = jax.random.normal(ks[4], (out2, in2), dtype=jnp.float32) * 0.05
    b_b = jax.random.normal(ks[5], (out2,), dtype=jnp.float32) * 0.05
    out_b = jax.block_until_ready(linear(x_b, w_b, b_b))
    ref_b = x_b @ w_b.T + b_b
    assert out_b.shape == (B2, out2)
    assert jnp.allclose(out_b, ref_b, atol=1e-3, rtol=1e-3)

    # --- Test 3: K larger than tk -> exercises the k-loop (bias-seeded accumulator
    # + resident f32 output block) and the v7x N-split branch.
    B3, in3, out3 = 128, 2048, 256
    x_c = jax.random.normal(ks[6], (B3, in3), dtype=jnp.float32)
    w_c = jax.random.normal(ks[7], (out3, in3), dtype=jnp.float32) * 0.03
    b_c = jax.random.normal(ks[8], (out3,), dtype=jnp.float32) * 0.03
    out_c = jax.block_until_ready(linear(x_c, w_c, b_c))
    ref_c = x_c @ w_c.T + b_c
    assert out_c.shape == (B3, out3)
    assert jnp.allclose(out_c, ref_c, atol=1e-3, rtol=1e-3)

    # --- Test 4: bf16 inputs/output -> exercises the f32-scratch epilogue kernel.
    x_h = x_b.astype(jnp.bfloat16)
    w_h = w_b.astype(jnp.bfloat16)
    b_h = b_b.astype(jnp.bfloat16)
    out_h = jax.block_until_ready(linear(x_h, w_h, b_h))
    ref_h = (x_h.astype(jnp.float32) @ w_h.astype(jnp.float32).T
             + b_h.astype(jnp.float32)).astype(jnp.bfloat16)
    assert out_h.shape == (B2, out2)
    assert jnp.allclose(out_h.astype(jnp.float32), ref_h.astype(jnp.float32),
                        atol=5e-2, rtol=5e-2)

    # TODO(synk): the module's custom backward() (grads w.r.t. input/weight/bias)
    # is not implemented here; only the forward pass is translated.
    print("KERNEL_OK")
</pallas_src>

<mosaic_0001>
module attributes {stable_mosaic.version = 11 : i64} {
  func.func @linear_kernel_f32(%arg0: i32, %arg1: i32, %arg2: i32, %arg3: memref<8x128xf32, #tpu.memory_space<vmem>>, %arg4: memref<128x128xf32, #tpu.memory_space<vmem>>, %arg5: memref<1x128xf32, #tpu.memory_space<vmem>>, %arg6: memref<8x128xf32, #tpu.memory_space<vmem>>) attributes {dimension_semantics = [#tpu.dimension_semantics<parallel>, #tpu.dimension_semantics<parallel>, #tpu.dimension_semantics<arbitrary>], iteration_bounds = array<i64: 1, 1, 1>, scalar_prefetch = 0 : i64, scratch_operands = 0 : i64, tpu.core_type = #tpu.core_type<tc>, window_params = [{transform_indices = @transform_0, window_bounds = array<i64: 8, 128>}, {transform_indices = @transform_1, window_bounds = array<i64: 128, 128>}, {transform_indices = @transform_2, window_bounds = array<i64: 1, 128>}, {transform_indices = @transform_3, window_bounds = array<i64: 8, 128>}]} {
    %c0_i32 = arith.constant 0 : i32
    %0 = arith.cmpi eq, %arg2, %c0_i32 : i32
    %1 = arith.extui %0 : i1 to i32
    %c0_i32_0 = arith.constant 0 : i32
    %2 = arith.cmpi ne, %1, %c0_i32_0 : i32
    scf.if %2 {
      %c0_8 = arith.constant 0 : index
      %c0_9 = arith.constant 0 : index
      %9 = vector.load %arg5[%c0_8, %c0_9] : memref<1x128xf32, #tpu.memory_space<vmem>>, vector<1x128xf32>
      %10 = vector.shape_cast %9 : vector<1x128xf32> to vector<1x128xf32>
      %11 = vector.broadcast %10 : vector<1x128xf32> to vector<8x128xf32>
      %c0_10 = arith.constant 0 : index
      %c0_11 = arith.constant 0 : index
      %12 = vector.load %arg6[%c0_10, %c0_11] : memref<8x128xf32, #tpu.memory_space<vmem>>, vector<8x128xf32>
      tpu.vector_store %arg6[%c0_10, %c0_11], %11 {strides = array<i32>} : memref<8x128xf32, #tpu.memory_space<vmem>>, vector<8x128xf32>,
    } else {
    }
    %c0 = arith.constant 0 : index
    %c0_1 = arith.constant 0 : index
    %3 = vector.load %arg6[%c0, %c0_1] : memref<8x128xf32, #tpu.memory_space<vmem>>, vector<8x128xf32>
    %c0_2 = arith.constant 0 : index
    %c0_3 = arith.constant 0 : index
    %4 = vector.load %arg3[%c0_2, %c0_3] : memref<8x128xf32, #tpu.memory_space<vmem>>, vector<8x128xf32>
    %c0_4 = arith.constant 0 : index
    %c0_5 = arith.constant 0 : index
    %5 = vector.load %arg4[%c0_4, %c0_5] : memref<128x128xf32, #tpu.memory_space<vmem>>, vector<128x128xf32>
    %cst = arith.constant dense<0.000000e+00> : vector<8x128xf32>
    %6 = tpu.matmul %4, %5, %cst {dimension_numbers = #tpu.dot_dimension_numbers<[1], [0], [0], [1], [0, 0, 1, 1], [], []>} : vector<8x128xf32>, vector<128x128xf32>, vector<8x128xf32> -> vector<8x128xf32>
    %7 = arith.addf %3, %6 : vector<8x128xf32>
    %c0_6 = arith.constant 0 : index
    %c0_7 = arith.constant 0 : index
    %8 = vector.load %arg6[%c0_6, %c0_7] : memref<8x128xf32, #tpu.memory_space<vmem>>, vector<8x128xf32>
    tpu.vector_store %arg6[%c0_6, %c0_7], %7 {strides = array<i32>} : memref<8x128xf32, #tpu.memory_space<vmem>>, vector<8x128xf32>,
    return
  }
  func.func @transform_0(%arg0: i32, %arg1: i32, %arg2: i32) -> (i32, i32) {
    %c0_i32 = arith.constant 0 : i32
    return %arg0, %arg2 : i32, i32
  }
  func.func @transform_1(%arg0: i32, %arg1: i32, %arg2: i32) -> (i32, i32) {
    %c0_i32 = arith.constant 0 : i32
    return %arg2, %arg1 : i32, i32
  }
  func.func @transform_2(%arg0: i32, %arg1: i32, %arg2: i32) -> (i32, i32) {
    %c0_i32 = arith.constant 0 : i32
    %c0_i32_0 = arith.constant 0 : i32
    return %c0_i32, %arg1 : i32, i32
  }
  func.func @transform_3(%arg0: i32, %arg1: i32, %arg2: i32) -> (i32, i32) {
    %c0_i32 = arith.constant 0 : i32
    return %arg0, %arg1 : i32, i32
  }
}

</mosaic_0001>

<bundles_post_ra>
// kernel: tpu_custom_call.1
= control target key start
LH: loop header
LB: loop body
LE: loop exit
PB: predicated region body
PF: predicated region fallthrough
CT: control target
= control target key end

     0   :  { %8 = vsyncpa [#allocation3], 0  ;;  %s233_s0 = inlined_call_operand.hbm [shape: f32[8,128], index: 0, kind: input, shape index: {}]   ;;  %s234_s1 = inlined_call_operand.hbm [shape: f32[128,128], index: 1, kind: input, shape index: {}]   ;;  %s235_s2 = inlined_call_operand.vmem [shape: f32[1,128], index: 2, kind: input, shape index: {}]   ;;  %s236_s3 = inlined_call_operand.hbm [shape: f32[8,128], index: 3, kind: output, shape index: {}]  }
   0x1   :  { %9 = vsyncpa [#allocation6], 0 }
   0x2   :  { %10 = vsyncpa [#allocation4], 0  ;;  %s16_s14 = sshll.u32 %s233_s0, 4  ;;  %s196_s15 = smov [#allocation2]   ;;  %s17_s14 = int_to_ptr.hbm [resolvable:$true] %s16_s14 }
   0x3   :  { %s18_s16 = sshll.u32 %s196_s15, 4  ;;  %s26_s19 = sshll.u32 %s234_s1, 4  ;;  %s19_s16 = int_to_ptr.vmem [resolvable:$true] %s18_s16  ;;  %s27_s19 = int_to_ptr.hbm [resolvable:$true] %s26_s19 }
   0x4   :  { %21 = dma.hbm_to_vmem [thread:$0]  %s17_s14, 128, %s19_s16, [#allocation3]  }
   0x5   :  { %s197_s20 = smov [#allocation5]   ;;  %s198_s22 = smov 128  }
   0x6   :  { %s28_s21 = sshll.u32 %s197_s20, 4  ;;  %s199_s23 = smov 8   ;;  %s29_s21 = int_to_ptr.vmem [resolvable:$true] %s28_s21 }
   0x7   :  { %34 = dma.hbm_to_vmem [thread:$0]  %s27_s19, 2048, %s29_s21, [#allocation6], %s198_s22, %s198_s22, %s199_s23  }
   0x8   :  { %190 = dma.done.wait [#allocation3], 128  }
   0x9   :  { %191 = vsyncadd [#allocation3], 4294967168 }
   0xa   :  { %192 = dma.done.wait [#allocation6], 2048  }
   0xb   :  { %193 = vsyncadd [#allocation6], 4294965248  ;;  %v71_v0 = vld [vmem:[#allocation5 + $0x78] sm:$0xff]  ;;  %v70_v1 = vld [vmem:[#allocation5 + $0x70] sm:$0xff]  ;;  %s200_s24 = smov [#allocation7]   ;;  %s101_s28 = sshll.u32 %s236_s3, 4  ;;  %s102_s28 = int_to_ptr.hbm [resolvable:$true] %s101_s28 }
   0xc   :  { %72 = vmatpush.msra.mxu0 %v71_v0  ;;  %v69_v2 = vld [vmem:[#allocation5 + $0x68] sm:$0xff]  ;;  %v68_v3 = vld [vmem:[#allocation5 + $0x60] sm:$0xff]  ;;  %v67_v4 = vld [vmem:[#allocation5 + $0x58] sm:$0xff]  ;;  %s99_s25 = sshll.u32 %s200_s24, 4  ;;  %s100_s25 = int_to_ptr.vmem [resolvable:$true] %s99_s25 }
   0xd   :  { %v66_v5 = vld [vmem:[#allocation5 + $0x50] sm:$0xff]  ;;  %v65_v6 = vld [vmem:[#allocation5 + $0x48] sm:$0xff]  ;;  %v64_v7 = vld [vmem:[#allocation5 + $0x40] sm:$0xff] }
   0xe   :  { %73 = vmatpush.msra.mxu0 %v70_v1  ;;  %v63_v8 = vld [vmem:[#allocation5 + $0x38] sm:$0xff]  ;;  %v62_v9 = vld [vmem:[#allocation5 + $0x30] sm:$0xff]  ;;  %v61_v10 = vld [vmem:[#allocation5 + $0x28] sm:$0xff] }
   0xf   :  { %v60_v11 = vld [vmem:[#allocation5 + $0x20] sm:$0xff]  ;;  %v59_v12 = vld [vmem:[#allocation5 + $0x18] sm:$0xff]  ;;  %v58_v13 = vld [vmem:[#allocation5 + $0x10] sm:$0xff] }
  0x10   :  { %74 = vmatpush.msra.mxu0 %v69_v2  ;;  %v57_v14 = vld [vmem:[#allocation5 + $0x8] sm:$0xff]  ;;  %v56_v15 = vld [vmem:[#allocation5] sm:$0xff]  ;;  %v55_v16 = vld [vmem:[#allocation2] sm:$0xff] }
  0x11   :  { %v117_v17 = vld [vmem:[%s235_s2] ss:$0 sm:$0xff] }
  0x12   :  { %75 = vmatpush.msra.mxu0 %v68_v3 }
  0x14   :  { %76 = vmatpush.msra.mxu0 %v67_v4 }
  0x16   :  { %77 = vmatpush.msra.mxu0 %v66_v5 }
  0x18   :  { %78 = vmatpush.msra.mxu0 %v65_v6 }
  0x1a   :  { %79 = vmatpush.msra.mxu0 %v64_v7 }
  0x1c   :  { %80 = vmatpush.msra.mxu0 %v63_v8 }
  0x1e   :  { %81 = vmatpush.msra.mxu0 %v62_v9 }
  0x20   :  { %82 = vmatpush.msra.mxu0 %v61_v10 }
  0x22   :  { %83 = vmatpush.msra.mxu0 %v60_v11 }
  0x24   :  { %84 = vmatpush.msra.mxu0 %v59_v12 }
  0x26   :  { %85 = vmatpush.msra.mxu0 %v58_v13 }
  0x28   :  { %86 = vmatpush.msra.mxu0 %v57_v14 }
  0x2a   :  { %87 = vmatpush.msra.mxu0 %v56_v15 }
  0x2b   :  { %88 = vmatmul.f32.vlgmr.msra.gmra.mxu0 %v55_v16 }
  0xa8   :  { %v89_v18 = vpop.f32.mrf.mxu0 }
  0xa9   :  { %v92_v19 = vadd.f32 %v117_v17, %v89_v18 }
  0xab   :  { %93 = vst [vmem:[#allocation7] sm:$0xff] %v92_v19 }
  0xac   :  { %104 = dma.vmem_to_hbm [thread:$0]  %s100_s25, 128, %s102_s28, [#allocation4]  }
  0xad   :  { %194 = dma.done.wait [#allocation4], 128  }
  0xae   :  { %195 = vsyncadd [#allocation4], 4294967168 }
  0xaf   :  { %109 = vsyncpa [#allocation3], 1 }
  0xb0   :  { %110 = vsyncpa [#allocation6], 1 }
  0xb1   :  { %111 = vsyncpa [#allocation4], 1 }

</bundles_post_ra>
